<compile_context>
chip_gen: v7x
topology: tpu7x:2x2x1
jax: 0.10.0
libtpu: 0.0.40
codegen_flags: <defaults>
</compile_context>

<pallas_src>
import functools

import jax
import jax.numpy as jnp
from jax.experimental import pallas as pl
from jax.experimental.pallas import tpu as pltpu


def _round_up(x, m):
    return ((x + m - 1) // m) * m


def _decoder_kernel(xs_ref, h0_ref, w_ih_ref, w_hh_ref, b_i_ref, b_hh_n_ref,
                    w_out_ref, b_out_ref, logits_ref, h_final_ref,
                    gi_scratch, hs_scratch):
    """Fused T-step GRU decode with hoisted input / deferred output projection."""
    Hp = h0_ref.shape[1]
    T = xs_ref.shape[0]
    wdt = w_ih_ref.dtype

    # ---- hoisted input projection: one batched (T,Hp)@(Hp,3Hp) matmul ----
    gi_scratch[...] = (
        jnp.dot(xs_ref[...].astype(wdt), w_ih_ref[...],
                preferred_element_type=jnp.float32)
        + b_i_ref[...]
    )

    w_hh = w_hh_ref[...]
    b_hh_n = b_hh_n_ref[...]

    def step(t, h):
        gi = gi_scratch[pl.ds(t, 1), :]                                 # (1, 3Hp)
        gh = jnp.dot(h.astype(wdt), w_hh,
                     preferred_element_type=jnp.float32)                # (1, 3Hp)
        # Lane-aligned 128-wide gate blocks (PyTorch gate order: r, z, n).
        r = jax.nn.sigmoid(gi[:, 0:Hp] + gh[:, 0:Hp])
        z = jax.nn.sigmoid(gi[:, Hp:2 * Hp] + gh[:, Hp:2 * Hp])
        n = jnp.tanh(gi[:, 2 * Hp:3 * Hp] + r * (gh[:, 2 * Hp:3 * Hp] + b_hh_n))
        h_new = (1.0 - z) * n + z * h
        hs_scratch[pl.ds(t, 1), :] = h_new
        return h_new

    h_last = jax.lax.fori_loop(0, T, step, h0_ref[...], unroll=(T <= 16))
    h_final_ref[...] = h_last

    # ---- deferred output projection: one batched matmul, lane-dense store ----
    logits_ref[...] = (
        jnp.dot(hs_scratch[...].astype(wdt), w_out_ref[...],
                preferred_element_type=jnp.float32)
        + b_out_ref[...]
    )


def prepare_decoder_params(params, weight_dtype=jnp.float32):
    """One-time parameter prep: transpose, lane-pad, combine biases.

    Raw params use PyTorch shapes: w_ih/w_hh (3H, H), b_ih/b_hh (3H,),
    w_out (O, H), b_out (O,). Gate order is r, z, n.
    bf16 weight_dtype is valid on every TPU generation (v5e included).
    """
    H = params["w_ih"].shape[1]
    O = params["w_out"].shape[0]
    Hp = _round_up(H, 128)
    Op = _round_up(O, 128)

    w_ih = params["w_ih"].astype(jnp.float32)
    w_hh = params["w_hh"].astype(jnp.float32)
    b_ih = params["b_ih"].astype(jnp.float32)
    b_hh = params["b_hh"].astype(jnp.float32)

    w_ih_t = jnp.zeros((Hp, 3 * Hp), jnp.float32)
    w_hh_t = jnp.zeros((Hp, 3 * Hp), jnp.float32)
    for g in range(3):  # each gate gets its own lane-aligned 128-wide block
        w_ih_t = w_ih_t.at[:H, g * Hp:g * Hp + H].set(w_ih[g * H:(g + 1) * H, :].T)
        w_hh_t = w_hh_t.at[:H, g * Hp:g * Hp + H].set(w_hh[g * H:(g + 1) * H, :].T)

    b_i = jnp.zeros((1, 3 * Hp), jnp.float32)
    b_i = b_i.at[0, 0:H].set(b_ih[0:H] + b_hh[0:H])                    # r (combined)
    b_i = b_i.at[0, Hp:Hp + H].set(b_ih[H:2 * H] + b_hh[H:2 * H])      # z (combined)
    b_i = b_i.at[0, 2 * Hp:2 * Hp + H].set(b_ih[2 * H:3 * H])          # n (input side)
    b_hh_n = jnp.zeros((1, Hp), jnp.float32).at[0, :H].set(b_hh[2 * H:3 * H])

    w_out_t = jnp.zeros((Hp, Op), jnp.float32).at[:H, :O].set(
        params["w_out"].astype(jnp.float32).T)
    b_out = jnp.zeros((1, Op), jnp.float32).at[0, :O].set(
        params["b_out"].astype(jnp.float32))

    weights = {
        "w_ih_t": w_ih_t.astype(weight_dtype),
        "w_hh_t": w_hh_t.astype(weight_dtype),
        "b_i": b_i,
        "b_hh_n": b_hh_n,
        "w_out_t": w_out_t.astype(weight_dtype),
        "b_out": b_out,
    }
    return {"H": H, "O": O, "Hp": Hp, "Op": Op, "weights": weights}


@functools.partial(jax.jit, static_argnames=("H", "O", "Hp", "Op"))
def _decode_impl(xs, hidden, w_ih_t, w_hh_t, b_i, b_hh_n, w_out_t, b_out,
                 *, H, O, Hp, Op):
    T = xs.shape[0]
    xs_pad = jnp.zeros((T, Hp), jnp.float32).at[:, :H].set(
        xs.reshape(T, H).astype(jnp.float32))
    h0 = jnp.zeros((1, Hp), jnp.float32).at[:, :H].set(
        hidden.reshape(1, H).astype(jnp.float32))

    vmem = pl.BlockSpec(memory_space=pltpu.MemorySpace.VMEM)

    logits_pad, h_pad = pl.pallas_call(
        _decoder_kernel,
        out_shape=(
            jax.ShapeDtypeStruct((T, Op), jnp.float32),
            jax.ShapeDtypeStruct((1, Hp), jnp.float32),
        ),
        in_specs=[vmem] * 8,
        out_specs=(vmem, vmem),
        scratch_shapes=[
            pltpu.VMEM((T, 3 * Hp), jnp.float32),   # gi for all timesteps
            pltpu.VMEM((T, Hp), jnp.float32),       # h_t for all timesteps
        ],
    )(xs_pad, h0, w_ih_t, w_hh_t, b_i, b_hh_n, w_out_t, b_out)

    return logits_pad[:, :O], h_pad[:, :H].reshape(1, 1, H)


def decoder_rnn_decode(xs, hidden, prepped):
    """Fused T-step GRU decode.

    xs:     (T, H) per-step inputs
    hidden: (1, 1, H) initial hidden
    returns (logits (T, O), hidden_final (1, 1, H))
    """
    w = prepped["weights"]
    return _decode_impl(xs, hidden, w["w_ih_t"], w["w_hh_t"], w["b_i"],
                        w["b_hh_n"], w["w_out_t"], w["b_out"],
                        H=prepped["H"], O=prepped["O"],
                        Hp=prepped["Hp"], Op=prepped["Op"])


def decoder_rnn_forward(x, hidden, prepped):
    """Mirrors DecoderRNN.forward (single GRU step + Linear head).

    x:      any shape with hidden_size elements (flattened like input.view(1,1,-1))
    hidden: (1, 1, hidden_size)
    returns (logits (1, output_size), hidden_new (1, 1, hidden_size))
    """
    H = prepped["H"]
    return decoder_rnn_decode(x.reshape(1, H), hidden, prepped)


# ----------------------------------------------------------------------------
# Pure-JAX reference of the PyTorch forward, for correctness checking.
# ----------------------------------------------------------------------------
def _reference_step(x, hidden, params):
    H = params["w_ih"].shape[1]
    x2 = x.reshape(1, H)
    h = hidden.reshape(1, H)
    gi = x2 @ params["w_ih"].T + params["b_ih"]
    gh = h @ params["w_hh"].T + params["b_hh"]
    gi_r, gi_z, gi_n = jnp.split(gi, 3, axis=1)
    gh_r, gh_z, gh_n = jnp.split(gh, 3, axis=1)
    r = jax.nn.sigmoid(gi_r + gh_r)
    z = jax.nn.sigmoid(gi_z + gh_z)
    n = jnp.tanh(gi_n + r * gh_n)
    h_new = (1.0 - z) * n + z * h
    logits = h_new @ params["w_out"].T + params["b_out"]
    return logits, h_new.reshape(1, 1, H)


def init_params(key, hidden_size, output_size):
    """Deterministic synthetic parameters matching nn.GRU(H,H) + nn.Linear(H,O)."""
    ks = jax.random.split(key, 6)
    scale = 1.0 / jnp.sqrt(hidden_size)
    return {
        "w_ih": jax.random.uniform(ks[0], (3 * hidden_size, hidden_size),
                                   jnp.float32, -scale, scale),
        "w_hh": jax.random.uniform(ks[1], (3 * hidden_size, hidden_size),
                                   jnp.float32, -scale, scale),
        "b_ih": jax.random.uniform(ks[2], (3 * hidden_size,), jnp.float32, -scale, scale),
        "b_hh": jax.random.uniform(ks[3], (3 * hidden_size,), jnp.float32, -scale, scale),
        "w_out": jax.random.uniform(ks[4], (output_size, hidden_size),
                                    jnp.float32, -scale, scale),
        "b_out": jax.random.uniform(ks[5], (output_size,), jnp.float32, -scale, scale),
    }


if __name__ == "__main__":
    hidden_size = 32
    output_size = 16
    T = 4

    key = jax.random.PRNGKey(0)
    k_p, k_x, k_h = jax.random.split(key, 3)

    params = init_params(k_p, hidden_size, output_size)
    prepped = prepare_decoder_params(params)       # one-time prep (transpose/pad/bias)

    x = jax.random.normal(k_x, (1, hidden_size), jnp.float32)
    hidden = jax.random.normal(k_h, (1, 1, hidden_size), jnp.float32)

    # --- single-step forward (exact module semantics) ---
    logits, h_new = decoder_rnn_forward(x, hidden, prepped)
    jax.block_until_ready((logits, h_new))

    ref_logits, ref_h = _reference_step(x, hidden, params)
    assert logits.shape == (1, output_size)
    assert h_new.shape == (1, 1, hidden_size)
    assert jnp.allclose(logits, ref_logits, atol=1e-5, rtol=1e-5)
    assert jnp.allclose(h_new, ref_h, atol=1e-5, rtol=1e-5)

    # --- fused T-step decode (single pallas_call, no per-step grid overhead) ---
    xs = jax.random.normal(jax.random.PRNGKey(1), (T, hidden_size), jnp.float32)
    logits_seq, h_final = decoder_rnn_decode(xs, hidden, prepped)
    jax.block_until_ready((logits_seq, h_final))

    ref_list = []
    h_ref = hidden
    for t in range(T):
        lt, h_ref = _reference_step(xs[t:t + 1], h_ref, params)
        ref_list.append(lt)
    ref_seq = jnp.concatenate(ref_list, axis=0)
    assert logits_seq.shape == (T, output_size)
    assert h_final.shape == (1, 1, hidden_size)
    assert jnp.allclose(logits_seq, ref_seq, atol=1e-5, rtol=1e-5)
    assert jnp.allclose(h_final, h_ref, atol=1e-5, rtol=1e-5)

    print("KERNEL_OK")
</pallas_src>

<mosaic_0001>
module attributes {stable_mosaic.version = 11 : i64} {
  func.func @_decoder_kernel(%arg0: memref<1x128xf32, #tpu.memory_space<vmem>>, %arg1: memref<1x128xf32, #tpu.memory_space<vmem>>, %arg2: memref<128x384xf32, #tpu.memory_space<vmem>>, %arg3: memref<128x384xf32, #tpu.memory_space<vmem>>, %arg4: memref<1x384xf32, #tpu.memory_space<vmem>>, %arg5: memref<1x128xf32, #tpu.memory_space<vmem>>, %arg6: memref<128x128xf32, #tpu.memory_space<vmem>>, %arg7: memref<1x128xf32, #tpu.memory_space<vmem>>, %arg8: memref<1x128xf32, #tpu.memory_space<vmem>>, %arg9: memref<1x128xf32, #tpu.memory_space<vmem>>, %arg10: memref<1x384xf32, #tpu.memory_space<vmem>>, %arg11: memref<1x128xf32, #tpu.memory_space<vmem>>) attributes {dimension_semantics = [], scalar_prefetch = 0 : i64, scratch_operands = 2 : i64, tpu.core_type = #tpu.core_type<tc>} {
    %c0 = arith.constant 0 : index
    %c0_0 = arith.constant 0 : index
    %0 = vector.load %arg0[%c0, %c0_0] : memref<1x128xf32, #tpu.memory_space<vmem>>, vector<1x128xf32>
    %c0_1 = arith.constant 0 : index
    %c0_2 = arith.constant 0 : index
    %1 = vector.load %arg2[%c0_1, %c0_2] : memref<128x384xf32, #tpu.memory_space<vmem>>, vector<128x384xf32>
    %cst = arith.constant dense<0.000000e+00> : vector<1x384xf32>
    %2 = tpu.matmul %0, %1, %cst {dimension_numbers = #tpu.dot_dimension_numbers<[1], [0], [0], [1], [0, 0, 1, 1], [], []>} : vector<1x128xf32>, vector<128x384xf32>, vector<1x384xf32> -> vector<1x384xf32>
    %c0_3 = arith.constant 0 : index
    %c0_4 = arith.constant 0 : index
    %3 = vector.load %arg4[%c0_3, %c0_4] : memref<1x384xf32, #tpu.memory_space<vmem>>, vector<1x384xf32>
    %4 = arith.addf %2, %3 : vector<1x384xf32>
    %c0_5 = arith.constant 0 : index
    %c0_6 = arith.constant 0 : index
    %5 = vector.load %arg10[%c0_5, %c0_6] : memref<1x384xf32, #tpu.memory_space<vmem>>, vector<1x384xf32>
    tpu.vector_store %arg10[%c0_5, %c0_6], %4 {strides = array<i32>} : memref<1x384xf32, #tpu.memory_space<vmem>>, vector<1x384xf32>,
    %c0_7 = arith.constant 0 : index
    %c0_8 = arith.constant 0 : index
    %6 = vector.load %arg3[%c0_7, %c0_8] : memref<128x384xf32, #tpu.memory_space<vmem>>, vector<128x384xf32>
    %c0_9 = arith.constant 0 : index
    %c0_10 = arith.constant 0 : index
    %7 = vector.load %arg5[%c0_9, %c0_10] : memref<1x128xf32, #tpu.memory_space<vmem>>, vector<1x128xf32>
    %c0_11 = arith.constant 0 : index
    %c0_12 = arith.constant 0 : index
    %8 = vector.load %arg1[%c0_11, %c0_12] : memref<1x128xf32, #tpu.memory_space<vmem>>, vector<1x128xf32>
    %c0_i32 = arith.constant 0 : i32
    %9 = arith.index_cast %c0_i32 : i32 to index
    %c0_13 = arith.constant 0 : index
    %10 = vector.load %arg10[%9, %c0_13] : memref<1x384xf32, #tpu.memory_space<vmem>>, vector<1x384xf32>
    %cst_14 = arith.constant dense<0.000000e+00> : vector<1x384xf32>
    %11 = tpu.matmul %8, %6, %cst_14 {dimension_numbers = #tpu.dot_dimension_numbers<[1], [0], [0], [1], [0, 0, 1, 1], [], []>} : vector<1x128xf32>, vector<128x384xf32>, vector<1x384xf32> -> vector<1x384xf32>
    %12 = vector.extract_strided_slice %10 {offsets = [0, 0], sizes = [1, 128], strides = [1, 1]} : vector<1x384xf32> to vector<1x128xf32>
    %13 = vector.extract_strided_slice %11 {offsets = [0, 0], sizes = [1, 128], strides = [1, 1]} : vector<1x384xf32> to vector<1x128xf32>
    %14 = arith.addf %12, %13 : vector<1x128xf32>
    %15 = arith.negf %14 : vector<1x128xf32>
    %16 = math.exp %15 : vector<1x128xf32>
    %cst_15 = arith.constant 1.000000e+00 : f32
    %17 = vector.broadcast %cst_15 : f32 to vector<1x128xf32>
    %18 = arith.addf %17, %16 : vector<1x128xf32>
    %19 = arith.divf %17, %18 : vector<1x128xf32>
    %20 = vector.extract_strided_slice %10 {offsets = [0, 128], sizes = [1, 128], strides = [1, 1]} : vector<1x384xf32> to vector<1x128xf32>
    %21 = vector.extract_strided_slice %11 {offsets = [0, 128], sizes = [1, 128], strides = [1, 1]} : vector<1x384xf32> to vector<1x128xf32>
    %22 = arith.addf %20, %21 : vector<1x128xf32>
    %23 = arith.negf %22 : vector<1x128xf32>
    %24 = math.exp %23 : vector<1x128xf32>
    %cst_16 = arith.constant 1.000000e+00 : f32
    %25 = vector.broadcast %cst_16 : f32 to vector<1x128xf32>
    %26 = arith.addf %25, %24 : vector<1x128xf32>
    %27 = arith.divf %25, %26 : vector<1x128xf32>
    %28 = vector.extract_strided_slice %10 {offsets = [0, 256], sizes = [1, 128], strides = [1, 1]} : vector<1x384xf32> to vector<1x128xf32>
    %29 = vector.extract_strided_slice %11 {offsets = [0, 256], sizes = [1, 128], strides = [1, 1]} : vector<1x384xf32> to vector<1x128xf32>
    %30 = arith.addf %29, %7 : vector<1x128xf32>
    %31 = arith.mulf %19, %30 : vector<1x128xf32>
    %32 = arith.addf %28, %31 : vector<1x128xf32>
    %33 = math.tanh %32 : vector<1x128xf32>
    %cst_17 = arith.constant 1.000000e+00 : f32
    %34 = vector.broadcast %cst_17 : f32 to vector<1x128xf32>
    %35 = arith.subf %34, %27 : vector<1x128xf32>
    %36 = arith.mulf %35, %33 : vector<1x128xf32>
    %37 = arith.mulf %27, %8 : vector<1x128xf32>
    %38 = arith.addf %36, %37 : vector<1x128xf32>
    %39 = arith.index_cast %c0_i32 : i32 to index
    %c0_18 = arith.constant 0 : index
    %40 = vector.load %arg11[%39, %c0_18] : memref<1x128xf32, #tpu.memory_space<vmem>>, vector<1x128xf32>
    tpu.vector_store %arg11[%39, %c0_18], %38 {strides = array<i32>} : memref<1x128xf32, #tpu.memory_space<vmem>>, vector<1x128xf32>,
    %c1_i32 = arith.constant 1 : i32
    %c0_19 = arith.constant 0 : index
    %c0_20 = arith.constant 0 : index
    %41 = vector.load %arg9[%c0_19, %c0_20] : memref<1x128xf32, #tpu.memory_space<vmem>>, vector<1x128xf32>
    tpu.vector_store %arg9[%c0_19, %c0_20], %38 {strides = array<i32>} : memref<1x128xf32, #tpu.memory_space<vmem>>, vector<1x128xf32>,
    %c0_21 = arith.constant 0 : index
    %c0_22 = arith.constant 0 : index
    %42 = vector.load %arg11[%c0_21, %c0_22] : memref<1x128xf32, #tpu.memory_space<vmem>>, vector<1x128xf32>
    %c0_23 = arith.constant 0 : index
    %c0_24 = arith.constant 0 : index
    %43 = vector.load %arg6[%c0_23, %c0_24] : memref<128x128xf32, #tpu.memory_space<vmem>>, vector<128x128xf32>
    %cst_25 = arith.constant dense<0.000000e+00> : vector<1x128xf32>
    %44 = tpu.matmul %42, %43, %cst_25 {dimension_numbers = #tpu.dot_dimension_numbers<[1], [0], [0], [1], [0, 0, 1, 1], [], []>} : vector<1x128xf32>, vector<128x128xf32>, vector<1x128xf32> -> vector<1x128xf32>
    %c0_26 = arith.constant 0 : index
    %c0_27 = arith.constant 0 : index
    %45 = vector.load %arg7[%c0_26, %c0_27] : memref<1x128xf32, #tpu.memory_space<vmem>>, vector<1x128xf32>
    %46 = arith.addf %44, %45 : vector<1x128xf32>
    %c0_28 = arith.constant 0 : index
    %c0_29 = arith.constant 0 : index
    %47 = vector.load %arg8[%c0_28, %c0_29] : memref<1x128xf32, #tpu.memory_space<vmem>>, vector<1x128xf32>
    tpu.vector_store %arg8[%c0_28, %c0_29], %46 {strides = array<i32>} : memref<1x128xf32, #tpu.memory_space<vmem>>, vector<1x128xf32>,
    return
  }
}

</mosaic_0001>

<bundles_post_ra>
// kernel: _decode_impl.1
= control target key start
LH: loop header
LB: loop body
LE: loop exit
PB: predicated region body
PF: predicated region fallthrough
CT: control target
= control target key end

     0   :  { %15 = vsyncpa [#allocation5], 0  ;;  %s1224_s0 = inlined_call_operand.vmem [shape: f32[1,128], index: 0, kind: input, shape index: {}]   ;;  %s1225_s1 = inlined_call_operand.vmem [shape: f32[1,128], index: 1, kind: input, shape index: {}]   ;;  %s1226_s2 = inlined_call_operand.hbm [shape: f32[128,384], index: 2, kind: input, shape index: {}]   ;;  %s1227_s3 = inlined_call_operand.hbm [shape: f32[128,384], index: 3, kind: input, shape index: {}]   ;;  %s1228_s4 = inlined_call_operand.vmem [shape: f32[1,384], index: 4, kind: input, shape index: {}]   ;;  %s1229_s5 = inlined_call_operand.vmem [shape: f32[1,128], index: 5, kind: input, shape index: {}]   ;;  %s1230_s6 = inlined_call_operand.hbm [shape: f32[128,128], index: 6, kind: input, shape index: {}]   ;;  %s1231_s7 = inlined_call_operand.vmem [shape: f32[1,128], index: 7, kind: input, shape index: {}]   ;;  %s1232_s8 = inlined_call_operand.hbm [shape: f32[1,128], index: 8, kind: output, shape index: {0}]   ;;  %s1233_s9 = inlined_call_operand.vmem [shape: f32[1,128], index: 9, kind: output, shape index: {1}]  }
   0x1   :  { %16 = vsyncpa [#allocation8], 0 }
   0x2   :  { %17 = vsyncpa [#allocation6], 0  ;;  %s1052_s30 = smov [#allocation7]   ;;  %s1053_s11 = smov [#allocation4]  }
   0x3   :  { %s39_s10 = sshll.u32 %s1052_s30, 4  ;;  %s27_s12 = sshll.u32 %s1053_s11, 4  ;;  %s40_s10 = int_to_ptr.vmem [resolvable:$true] %s39_s10  ;;  %s1114_s12 = int_to_ptr.vmem [resolvable:$true] %s27_s12 }
   0x4   :  { %s958_s15 = scalar_lea.hbm %s1227_s3, 6144 }
   0x5   :  { %p959_p0 = scmp.ne.s32.totalorder %s1227_s3, %s958_s15  ;;  %p962_p1 = scmp.lt.u32.totalorder %s958_s15, %s1227_s3 }
   0x7   :  { %p964_p2 = pnand %p962_p1, %p959_p0 }
   0x9   :  { %967 = shalt.err (!%p964_p2)
}
   0xa   :  { %s968_s20 = scalar_lea.vmem %s40_s10, 6144  ;;  %p973_p4 = scmp.lt.s32.totalorder %s40_s10, %s40_s10 }
   0xb   :  { %p969_p3 = scmp.ne.s32.totalorder %s40_s10, %s968_s20  ;;  %p974_p5 = scmp.lt.s32.totalorder %s968_s20, %s968_s20 }
   0xd   :  { %p975_p6 = por %p974_p5, %p973_p4 }
   0xf   :  { %p976_p7 = pnand %p975_p6, %p969_p3 }
  0x11   :  { %979 = shalt.err (!%p976_p7)
}
  0x12   :  { %s1054_s21 = smov 384   ;;  %s1055_s22 = smov 24  }
  0x13   :  { %45 = dma.hbm_to_vmem [thread:$0]  %s1227_s3, 6144, %s40_s10, [#allocation8], %s1054_s21, %s1054_s21, %s1055_s22  }
  0x14   :  { %s980_s27 = scalar_lea.hbm %s1226_s2, 6144 }
  0x15   :  { %p981_p8 = scmp.ne.s32.totalorder %s1226_s2, %s980_s27  ;;  %p984_p9 = scmp.lt.u32.totalorder %s980_s27, %s1226_s2 }
  0x17   :  { %p986_p10 = pnand %p984_p9, %p981_p8 }
  0x19   :  { %989 = shalt.err (!%p986_p10)
}
  0x1a   :  { %s990_s13 = scalar_lea.vmem %s1114_s12, 6144  ;;  %p995_p12 = scmp.lt.s32.totalorder %s1114_s12, %s1114_s12 }
  0x1b   :  { %p991_p11 = scmp.ne.s32.totalorder %s1114_s12, %s990_s13  ;;  %p996_p13 = scmp.lt.s32.totalorder %s990_s13, %s990_s13 }
  0x1d   :  { %p997_p0 = por %p996_p13, %p995_p12 }
  0x1f   :  { %p998_p1 = pnand %p997_p0, %p991_p11 }
  0x21   :  { %1001 = shalt.err (!%p998_p1)
}
  0x22   :  { %33 = dma.hbm_to_vmem [thread:$0]  %s1226_s2, 6144, %s1114_s12, [#allocation5], %s1054_s21, %s1054_s21, %s1055_s22  }
  0x23   :  { %s1056_s14 = smov [#allocation9]   ;;  %s1002_s18 = scalar_lea.hbm %s1230_s6, 2048 }
  0x24   :  { %s55_s15 = sshll.u32 %s1056_s14, 4  ;;  %p1003_p2 = scmp.ne.s32.totalorder %s1230_s6, %s1002_s18  ;;  %s56_s15 = int_to_ptr.vmem [resolvable:$true] %s55_s15 }
  0x25   :  { %p1006_p3 = scmp.lt.u32.totalorder %s1002_s18, %s1230_s6 }
  0x27   :  { %p1008_p4 = pnand %p1006_p3, %p1003_p2 }
  0x29   :  { %1011 = shalt.err (!%p1008_p4)
}
  0x2a   :  { %s1012_s25 = scalar_lea.vmem %s56_s15, 2048  ;;  %p1017_p6 = scmp.lt.s32.totalorder %s56_s15, %s56_s15 }
  0x2b   :  { %p1013_p5 = scmp.ne.s32.totalorder %s56_s15, %s1012_s25  ;;  %p1018_p7 = scmp.lt.s32.totalorder %s1012_s25, %s1012_s25 }
  0x2d   :  { %p1019_p8 = por %p1018_p7, %p1017_p6 }
  0x2f   :  { %p1020_p9 = pnand %p1019_p8, %p1013_p5 }
  0x31   :  { %1023 = shalt.err (!%p1020_p9)
}
  0x32   :  { %s1057_s2 = smov 128   ;;  %s1058_s12 = smov 8  }
  0x33   :  { %61 = dma.hbm_to_vmem [thread:$0]  %s1230_s6, 2048, %s56_s15, [#allocation8], %s1057_s2, %s1057_s2, %s1058_s12  }
  0x34   :  { %1046 = dma.done.wait [#allocation5], 6144  }
  0x35   :  { %1047 = vsyncadd [#allocation5], 4294961152 }
  0x36   :  { %1048 = dma.done.wait [#allocation8], 8192  }
  0x37   :  { %1049 = vsyncadd [#allocation8], 4294959104  ;;  %v1059_v0 = vmov 0.0|0.0   ;;  %v1060_v1 = vmov 0.0   ;;  %vm1061_vm0 = vmmov 0   ;;  %v75_v2 = vld [vmem:[#allocation4 + $0x8] sm:$0xff] }
  0x38   :  { %832 = vmatprep.subr.bf16.mxu1 %v1059_v0  ;;  %203 = vmatprep.mubr.f32.mxu0 %v1060_v1  ;;  %v78_v3 = vld [vmem:[#allocation4 + $0x20] sm:$0xff]  ;;  %v77_v6 = vld [vmem:[#allocation4 + $0x18] sm:$0xff]  ;;  %v84_v8 = vld [vmem:[#allocation4 + $0x50] sm:$0xff]  ;;  %s1063_s3 = smov [#allocation10]  }
  0x39   :  { %727 = vmatprep.mubr.msk.f32.mxu1 %vm1061_vm0, %v1060_v1  ;;  %v74_v4 = vld [vmem:[#allocation4] sm:$0xff]  ;;  %v800_v5 = vpack.c.bf16 %v78_v3, %v75_v2  ;;  %v81_v7 = vld [vmem:[#allocation4 + $0x38] sm:$0xff]  ;;  %v76_v11 = vld [vmem:[#allocation4 + $0x10] sm:$0xff]  ;;  %s628_s10 = sshll.u32 %s1063_s3, 4  ;;  %s629_s10 = int_to_ptr.vmem [resolvable:$true] %s628_s10 }
  0x3a   :  { %v802_v9 = vpack.c.bf16 %v77_v6, %v74_v4  ;;  %v804_v10 = vpack.c.bf16 %v84_v8, %v81_v7  ;;  %v79_v12 = vld [vmem:[#allocation4 + $0x28] sm:$0xff]  ;;  %v80_v13 = vld [vmem:[#allocation4 + $0x30] sm:$0xff]  ;;  %v90_v17 = vld [vmem:[#allocation4 + $0x80] sm:$0xff]  ;;  %s1024_s14 = scalar_lea.vmem %s629_s10, 16  ;;  %s1028_s15 = scalar_lea.vmem %s629_s10, 32 }
  0x3b   :  { %801 = vmatprep.subr.bf16.mxu0 %v800_v5  ;;  %v833_v14 = vpack.c.bf16 %v79_v12, %v76_v11  ;;  %v83_v15 = vld [vmem:[#allocation4 + $0x48] sm:$0xff]  ;;  %v82_v19 = vld [vmem:[#allocation4 + $0x40] sm:$0xff]  ;;  %v85_v20 = vld [vmem:[#allocation4 + $0x58] sm:$0xff]  ;;  %p1025_p10 = scmp.ne.s32.totalorder %s629_s10, %s1024_s14  ;;  %p1029_p11 = scmp.lt.s32.totalorder %s629_s10, %s629_s10 }
  0x3c   :  { %v87_v16 = vld [vmem:[#allocation4 + $0x68] sm:$0xff]  ;;  %803 = vmatpush1.bf16.msra.mxu0 %v802_v9  ;;  %v806_v18 = vpack.c.bf16 %v83_v15, %v80_v13  ;;  %v836_v22 = vpack.c.bf16 %v85_v20, %v82_v19  ;;  %v86_v23 = vld [vmem:[#allocation4 + $0x60] sm:$0xff]  ;;  %v89_v24 = vld [vmem:[#allocation4 + $0x78] sm:$0xff]  ;;  %p1030_p12 = scmp.lt.s32.totalorder %s1028_s15, %s1024_s14 }
  0x3d   :  { %805 = vmatprep.subr.bf16.mxu0 %v804_v10  ;;  %834 = vmatpush3.bf16.msra.mxu1 %v833_v14  ;;  %v808_v21 = vpack.c.bf16 %v90_v17, %v87_v16  ;;  %v93_v25 = vld [vmem:[#allocation4 + $0x98] sm:$0xff]  ;;  %v96_v26 = vld [vmem:[#allocation4 + $0xb0] sm:$0xff]  ;;  %v91_v28 = vld [vmem:[#allocation4 + $0x88] sm:$0xff]  ;;  %v810_v29 = vpack.c.bf16 %v89_v24, %v86_v23 }
  0x3e   :  { %835 = vmatprep.subr.bf16.mxu1 %v1059_v0  ;;  %v88_v27 = vld [vmem:[#allocation4 + $0x70] sm:$0xff]  ;;  %v812_v30 = vpack.c.bf16 %v96_v26, %v93_v25  ;;  %v95_v33 = vld [vmem:[#allocation4 + $0xa8] sm:$0xff]  ;;  %v102_v35 = vld [vmem:[#allocation4 + $0xe0] sm:$0xff]  ;;  %p1031_p13 = por %p1030_p12, %p1029_p11 }
  0x3f   :  { %v839_v31 = vpack.c.bf16 %v91_v28, %v88_v27  ;;  %v92_v32 = vld [vmem:[#allocation4 + $0x90] sm:$0xff]  ;;  %v99_v34 = vld [vmem:[#allocation4 + $0xc8] sm:$0xff]  ;;  %v94_v36 = vld [vmem:[#allocation4 + $0xa0] sm:$0xff] }
  0x40   :  { %807 = vmatpush1.bf16.msra.mxu0 %v806_v18  ;;  %v97_v37 = vld [vmem:[#allocation4 + $0xb8] sm:$0xff]  ;;  %v814_v38 = vpack.c.bf16 %v95_v33, %v92_v32  ;;  %v816_v39 = vpack.c.bf16 %v102_v35, %v99_v34  ;;  %v98_v41 = vld [vmem:[#allocation4 + $0xc0] sm:$0xff]  ;;  %v108_v44 = vld [vmem:[#allocation4 + $0x110] sm:$0xff]  ;;  %p1032_p0 = pnand %p1031_p13, %p1025_p10 }
  0x41   :  { %809 = vmatprep.subr.bf16.mxu0 %v808_v21  ;;  %837 = vmatpush3.bf16.msra.mxu1 %v836_v22  ;;  %v842_v40 = vpack.c.bf16 %v97_v37, %v94_v36  ;;  %v101_v42 = vld [vmem:[#allocation4 + $0xd8] sm:$0xff]  ;;  %v100_v45 = vld [vmem:[#allocation4 + $0xd0] sm:$0xff]  ;;  %v103_v46 = vld [vmem:[#allocation4 + $0xe8] sm:$0xff] }
  0x42   :  { %838 = vmatprep.subr.bf16.mxu1 %v1059_v0  ;;  %v105_v43 = vld [vmem:[#allocation4 + $0xf8] sm:$0xff]  ;;  %v818_v47 = vpack.c.bf16 %v101_v42, %v98_v41  ;;  %v845_v49 = vpack.c.bf16 %v103_v46, %v100_v45  ;;  %v104_v50 = vld [vmem:[#allocation4 + $0xf0] sm:$0xff]  ;;  %v107_v51 = vld [vmem:[#allocation4 + $0x108] sm:$0xff] }
  0x43   :  { %v820_v48 = vpack.c.bf16 %v108_v44, %v105_v43  ;;  %v111_v52 = vld [vmem:[#allocation4 + $0x128] sm:$0xff]  ;;  %v114_v53 = vld [vmem:[#allocation4 + $0x140] sm:$0xff]  ;;  %v109_v55 = vld [vmem:[#allocation4 + $0x118] sm:$0xff]  ;;  %v822_v56 = vpack.c.bf16 %v107_v51, %v104_v50 }
  0x44   :  { %811 = vmatpush1.bf16.msra.mxu0 %v810_v29  ;;  %v106_v54 = vld [vmem:[#allocation4 + $0x100] sm:$0xff]  ;;  %v824_v57 = vpack.c.bf16 %v114_v53, %v111_v52  ;;  %v113_v60 = vld [vmem:[#allocation4 + $0x138] sm:$0xff]  ;;  %v120_v62 = vld [vmem:[#allocation4 + $0x170] sm:$0xff] }
  0x45   :  { %813 = vmatprep.subr.bf16.mxu0 %v812_v30  ;;  %840 = vmatpush3.bf16.msra.mxu1 %v839_v31  ;;  %v848_v58 = vpack.c.bf16 %v109_v55, %v106_v54  ;;  %v110_v59 = vld [vmem:[#allocation4 + $0x120] sm:$0xff]  ;;  %v117_v61 = vld [vmem:[#allocation4 + $0x158] sm:$0xff]  ;;  %v112_v63 = vld [vmem:[#allocation4 + $0x130] sm:$0xff] }
  0x46   :  { %841 = vmatprep.subr.bf16.mxu1 %v1059_v0  ;;  %v115_v2 = vld [vmem:[#allocation4 + $0x148] sm:$0xff]  ;;  %v826_v3 = vpack.c.bf16 %v113_v60, %v110_v59  ;;  %v828_v4 = vpack.c.bf16 %v120_v62, %v117_v61  ;;  %v116_v6 = vld [vmem:[#allocation4 + $0x150] sm:$0xff]  ;;  %v118_v8 = vld [vmem:[#allocation4 + $0x160] sm:$0xff] }
  0x47   :  { %v851_v5 = vpack.c.bf16 %v115_v2, %v112_v63  ;;  %v119_v7 = vld [vmem:[#allocation4 + $0x168] sm:$0xff]  ;;  %v121_v9 = vld [vmem:[#allocation4 + $0x178] sm:$0xff]  ;;  %v316_v11 = vld [vmem:[#allocation7 + $0x20] sm:$0xff] }
  0x48   :  { %815 = vmatpush1.bf16.msra.mxu0 %v814_v38  ;;  %v313_v10 = vld [vmem:[#allocation7 + $0x8] sm:$0xff]  ;;  %v830_v12 = vpack.c.bf16 %v119_v7, %v116_v6  ;;  %v854_v13 = vpack.c.bf16 %v121_v9, %v118_v8  ;;  %v312_v15 = vld [vmem:[#allocation7] sm:$0xff]  ;;  %v315_v16 = vld [vmem:[#allocation7 + $0x18] sm:$0xff] }
  0x49   :  { %817 = vmatprep.subr.bf16.mxu0 %v816_v39  ;;  %843 = vmatpush3.bf16.msra.mxu1 %v842_v40  ;;  %v856_v14 = vpack.c.bf16 %v316_v11, %v313_v10  ;;  %v319_v17 = vld [vmem:[#allocation7 + $0x38] sm:$0xff]  ;;  %v322_v18 = vld [vmem:[#allocation7 + $0x50] sm:$0xff]  ;;  %v317_v20 = vld [vmem:[#allocation7 + $0x28] sm:$0xff]  ;;  %v858_v22 = vpack.c.bf16 %v315_v16, %v312_v15 }
  0x4a   :  { %844 = vmatprep.subr.bf16.mxu1 %v1059_v0  ;;  %v314_v19 = vld [vmem:[#allocation7 + $0x10] sm:$0xff]  ;;  %v73_v21 = vld [vmem:[%s1224_s0] sm:$0x1]  ;;  %v860_v23 = vpack.c.bf16 %v322_v18, %v319_v17  ;;  %v321_v25 = vld [vmem:[#allocation7 + $0x48] sm:$0xff] }
  0x4b   :  { %v318_v24 = vld [vmem:[#allocation7 + $0x30] sm:$0xff]  ;;  %v325_v26 = vld [vmem:[#allocation7 + $0x68] sm:$0xff]  ;;  %v889_v27 = vpack.c.bf16 %v317_v20, %v314_v19  ;;  %v328_v28 = vld [vmem:[#allocation7 + $0x80] sm:$0xff] }
  0x4c   :  { %819 = vmatpush1.bf16.msra.mxu0 %v818_v47  ;;  %v320_v29 = vld [vmem:[#allocation7 + $0x40] sm:$0xff]  ;;  %v323_v30 = vld [vmem:[#allocation7 + $0x58] sm:$0xff]  ;;  %v862_v31 = vpack.c.bf16 %v321_v25, %v318_v24  ;;  %v864_v32 = vpack.c.bf16 %v328_v28, %v325_v26  ;;  %v334_v37 = vld [vmem:[#allocation7 + $0xb0] sm:$0xff] }
  0x4d   :  { %821 = vmatprep.subr.bf16.mxu0 %v820_v48  ;;  %846 = vmatpush3.bf16.msra.mxu1 %v845_v49  ;;  %v324_v33 = vld [vmem:[#allocation7 + $0x60] sm:$0xff]  ;;  %v327_v34 = vld [vmem:[#allocation7 + $0x78] sm:$0xff]  ;;  %v892_v36 = vpack.c.bf16 %v323_v30, %v320_v29  ;;  %v326_v38 = vld [vmem:[#allocation7 + $0x70] sm:$0xff] }
  0x4e   :  { %847 = vmatprep.subr.bf16.mxu1 %v1059_v0  ;;  %v331_v35 = vld [vmem:[#allocation7 + $0x98] sm:$0xff]  ;;  %v329_v39 = vld [vmem:[#allocation7 + $0x88] sm:$0xff]  ;;  %v866_v40 = vpack.c.bf16 %v327_v34, %v324_v33  ;;  %v330_v42 = vld [vmem:[#allocation7 + $0x90] sm:$0xff] }
  0x4f   :  { %v868_v41 = vpack.c.bf16 %v334_v37, %v331_v35  ;;  %v333_v43 = vld [vmem:[#allocation7 + $0xa8] sm:$0xff]  ;;  %v895_v45 = vpack.c.bf16 %v329_v39, %v326_v38  ;;  %v340_v46 = vld [vmem:[#allocation7 + $0xe0] sm:$0xff]  ;;  %v335_v48 = vld [vmem:[#allocation7 + $0xb8] sm:$0xff] }
  0x50   :  { %823 = vmatpush1.bf16.msra.mxu0 %v822_v56  ;;  %v337_v44 = vld [vmem:[#allocation7 + $0xc8] sm:$0xff]  ;;  %v332_v47 = vld [vmem:[#allocation7 + $0xa0] sm:$0xff]  ;;  %v870_v49 = vpack.c.bf16 %v333_v43, %v330_v42  ;;  %v339_v52 = vld [vmem:[#allocation7 + $0xd8] sm:$0xff] }
  0x51   :  { %825 = vmatprep.subr.bf16.mxu0 %v824_v57  ;;  %849 = vmatpush3.bf16.msra.mxu1 %v848_v58  ;;  %v872_v50 = vpack.c.bf16 %v340_v46, %v337_v44  ;;  %v336_v51 = vld [vmem:[#allocation7 + $0xc0] sm:$0xff]  ;;  %v343_v53 = vld [vmem:[#allocation7 + $0xf8] sm:$0xff]  ;;  %v898_v54 = vpack.c.bf16 %v335_v48, %v332_v47  ;;  %v346_v55 = vld [vmem:[#allocation7 + $0x110] sm:$0xff]  ;;  %v124_v47 = vlaneseq }
  0x52   :  { %850 = vmatprep.subr.bf16.mxu1 %v1059_v0  ;;  %v338_v56 = vld [vmem:[#allocation7 + $0xd0] sm:$0xff]  ;;  %v341_v57 = vld [vmem:[#allocation7 + $0xe8] sm:$0xff]  ;;  %v874_v58 = vpack.c.bf16 %v339_v52, %v336_v51  ;;  %v876_v59 = vpack.c.bf16 %v346_v55, %v343_v53  ;;  %v352_v2 = vld [vmem:[#allocation7 + $0x140] sm:$0xff] }
  0x53   :  { %v342_v60 = vld [vmem:[#allocation7 + $0xf0] sm:$0xff]  ;;  %v345_v61 = vld [vmem:[#allocation7 + $0x108] sm:$0xff]  ;;  %v901_v63 = vpack.c.bf16 %v341_v57, %v338_v56  ;;  %v348_v7 = vld [vmem:[#allocation7 + $0x120] sm:$0xff]  ;;  %v125_v48 = vshrl.u32 %v124_v47, 7  ;;  %vm309_vm1 = vcmp.lt.s32.totalorder %v124_v47, 384 }
  0x54   :  { %827 = vmatpush1.bf16.msra.mxu0 %v826_v3  ;;  %v349_v62 = vld [vmem:[#allocation7 + $0x128] sm:$0xff]  ;;  %v344_v3 = vld [vmem:[#allocation7 + $0x100] sm:$0xff]  ;;  %v351_v8 = vld [vmem:[#allocation7 + $0x138] sm:$0xff] }
  0x55   :  { %829 = vmatprep.subr.bf16.mxu0 %v828_v4  ;;  %852 = vmatpush3.bf16.msra.mxu1 %v851_v5  ;;  %v347_v4 = vld [vmem:[#allocation7 + $0x118] sm:$0xff]  ;;  %v878_v5 = vpack.c.bf16 %v345_v61, %v342_v60  ;;  %v880_v6 = vpack.c.bf16 %v352_v2, %v349_v62  ;;  %v358_v11 = vld [vmem:[#allocation7 + $0x170] sm:$0xff]  ;;  %v357_v17 = vld [vmem:[#allocation7 + $0x168] sm:$0xff]  ;;  %v126_v51 = vsub.s32 0, %v125_v48  ;;  %v130_v53 = vsub.s32 1, %v125_v48 }
  0x56   :  { %853 = vmatprep.subr.bf16.mxu1 %v1059_v0  ;;  %v355_v9 = vld [vmem:[#allocation7 + $0x158] sm:$0xff]  ;;  %v904_v10 = vpack.c.bf16 %v347_v4, %v344_v3  ;;  %v354_v16 = vld [vmem:[#allocation7 + $0x150] sm:$0xff]  ;;  %v356_v19 = vld [vmem:[#allocation7 + $0x160] sm:$0xff] }
  0x57   :  { %v884_v15 = vpack.c.bf16 %v358_v11, %v355_v9  ;;  %v359_v20 = vld [vmem:[#allocation7 + $0x178] sm:$0xff]  ;;  %v534_v24 = vld [vmem:[#allocation9] sm:$0xff]  ;;  %v535_v25 = vld [vmem:[#allocation9 + $0x8] sm:$0xff] }
  0x58   :  { %831 = vmatpush1.bf16.msra.mxu0 %v830_v12  ;;  %v350_v12 = vld [vmem:[#allocation7 + $0x130] sm:$0xff]  ;;  %v913_v26 = vpack.c.bf16 %v535_v25, %v534_v24  ;;  %v537_v28 = vld [vmem:[#allocation9 + $0x18] sm:$0xff]  ;;  %v538_v30 = vld [vmem:[#allocation9 + $0x20] sm:$0xff] }
  0x59   :  { %855 = vmatpush3.bf16.msra.mxu1 %v854_v13  ;;  %857 = vmatprep.subr.bf16.mxu0 %v856_v14  ;;  %v353_v13 = vld [vmem:[#allocation7 + $0x148] sm:$0xff]  ;;  %v882_v14 = vpack.c.bf16 %v351_v8, %v348_v7  ;;  %v540_v33 = vld [vmem:[#allocation9 + $0x30] sm:$0xff]  ;;  %v542_v35 = vld [vmem:[#allocation9 + $0x40] sm:$0xff] }
  0x5a   :  { %888 = vmatprep.subr.bf16.mxu1 %v1059_v0  ;;  %v907_v18 = vpack.c.bf16 %v353_v13, %v350_v12  ;;  %v544_v38 = vld [vmem:[#allocation9 + $0x50] sm:$0xff]  ;;  %v545_v39 = vld [vmem:[#allocation9 + $0x58] sm:$0xff]  ;;  %v547_v42 = vld [vmem:[#allocation9 + $0x68] sm:$0xff] }
  0x5b   :  { %204 = vmatmul.mubr.f32.vlgmr.msra.gmra.mrb[0].mxu0 %v73_v21  ;;  %v548_v44 = vld [vmem:[#allocation9 + $0x70] sm:$0xff]  ;;  %v122_v52 = vld [vmem:[%s1228_s4] sm:$0x7] }
  0x5c   :  { %859 = vmatpush1.bf16.msra.mxu0 %v858_v22  ;;  %728 = vmatmul.mubr.f32.vlgmr.msra.gmra.mrb[0].mxu1 %v73_v21  ;;  %v886_v21 = vpack.c.bf16 %v357_v17, %v354_v16  ;;  %v910_v22 = vpack.c.bf16 %v359_v20, %v356_v19  ;;  %v127_v56 = vrot.slane %v122_v52, %v126_v51 }
  0x5d   :  { %861 = vmatprep.subr.bf16.mxu0 %v860_v23  ;;  %890 = vmatpush3.bf16.msra.mxu1 %v889_v27  ;;  %v1185_v23 = vld [vmem:[%s1225_s1] sm:$0x1]  ;;  %v536_v27 = vld [vmem:[#allocation9 + $0x10] sm:$0xff]  ;;  %v131_v57 = vrot.slane %v122_v52, %v130_v53 }
  0x5e   :  { %891 = vmatprep.subr.bf16.mxu1 %v1059_v0  ;;  %427 = vmatprep.mubr.f32.mxu0 %v1060_v1  ;;  %v916_v29 = vpack.c.bf16 %v537_v28, %v536_v27 }
  0x5f   :  { %762 = vmatprep.mubr.msk.f32.mxu1 %vm1061_vm0, %v1060_v1 }
  0x60   :  { %863 = vmatpush1.bf16.msra.mxu0 %v862_v31  ;;  %v539_v31 = vld [vmem:[#allocation9 + $0x28] sm:$0xff] }
  0x61   :  { %865 = vmatprep.subr.bf16.mxu0 %v864_v32  ;;  %893 = vmatpush3.bf16.msra.mxu1 %v892_v36  ;;  %v919_v32 = vpack.c.bf16 %v539_v31, %v538_v30  ;;  %v543_v36 = vld [vmem:[#allocation9 + $0x48] sm:$0xff] }
  0x62   :  { %894 = vmatprep.subr.bf16.mxu1 %v1059_v0  ;;  %v925_v37 = vpack.c.bf16 %v543_v36, %v542_v35  ;;  %v550_v36 = vld [vmem:[%s1231_s7] sm:$0x1] }
  0x64   :  { %867 = vmatpush1.bf16.msra.mxu0 %v866_v40  ;;  %v928_v40 = vpack.c.bf16 %v545_v39, %v544_v38 }
  0x65   :  { %869 = vmatprep.subr.bf16.mxu0 %v868_v41  ;;  %896 = vmatpush3.bf16.msra.mxu1 %v895_v45  ;;  %v546_v41 = vld [vmem:[#allocation9 + $0x60] sm:$0xff]  ;;  %v549_v45 = vld [vmem:[#allocation9 + $0x78] sm:$0xff] }
  0x66   :  { %897 = vmatprep.subr.bf16.mxu1 %v1059_v0  ;;  %v931_v43 = vpack.c.bf16 %v547_v42, %v546_v41  ;;  %v934_v46 = vpack.c.bf16 %v549_v45, %v548_v44 }
  0x68   :  { %871 = vmatpush1.bf16.msra.mxu0 %v870_v49  ;;  %v1062_v49 = vmov 1966171168  }
  0x69   :  { %873 = vmatprep.subr.bf16.mxu0 %v872_v50  ;;  %899 = vmatpush3.bf16.msra.mxu1 %v898_v54  ;;  %v285_v50 = vunpack.c.l.s4 %v1062_v49  ;;  %v134_v54 = vsub.s32 2, %v125_v48 }
  0x6a   :  { %900 = vmatprep.subr.bf16.mxu1 %v1059_v0 }
  0x6b   :  { %v286_v55 = vunpack.c.0.s8 %v285_v50 }
  0x6c   :  { %875 = vmatpush1.bf16.msra.mxu0 %v874_v58  ;;  %v135_v58 = vrot.slane %v122_v52, %v134_v54 }
  0x6d   :  { %877 = vmatprep.subr.bf16.mxu0 %v876_v59  ;;  %902 = vmatpush3.bf16.msra.mxu1 %v901_v63  ;;  %v289_v60 = vsub.s32 %v286_v55, %v125_v48 }
  0x6e   :  { %903 = vmatprep.subr.bf16.mxu1 %v1059_v0 }
  0x70   :  { %879 = vmatpush1.bf16.msra.mxu0 %v878_v5 }
  0x71   :  { %881 = vmatprep.subr.bf16.mxu0 %v880_v6  ;;  %905 = vmatpush3.bf16.msra.mxu1 %v904_v10 }
  0x72   :  { %906 = vmatprep.subr.bf16.mxu1 %v1059_v0 }
  0x74   :  { %883 = vmatpush1.bf16.msra.mxu0 %v882_v14 }
  0x75   :  { %885 = vmatprep.subr.bf16.mxu0 %v884_v15  ;;  %908 = vmatpush3.bf16.msra.mxu1 %v907_v18 }
  0x76   :  { %909 = vmatprep.subr.bf16.mxu1 %v1059_v0 }
  0x78   :  { %887 = vmatpush1.bf16.msra.mxu0 %v886_v21 }
  0x79   :  { %911 = vmatpush3.bf16.msra.mxu1 %v910_v22  ;;  %912 = vmatprep.subr.bf16.mxu0 %v1059_v0  ;;  %v360_v22 = vld [vmem:[%s1229_s5] sm:$0x1] }
  0x7b   :  { %428 = vmatmul.mubr.f32.vlgmr.msra.gmra.mrb[2].mxu0 %v1185_v23 }
  0x7c   :  { %763 = vmatmul.mubr.f32.vlgmr.msra.gmra.mrb[2].mxu1 %v1185_v23  ;;  %797 = vmatprep.mubr.msk.f32.mxu0 %vm1061_vm0, %v1060_v1  ;;  %v541_v1 = vld [vmem:[#allocation9 + $0x38] sm:$0xff] }
  0x7d   :  { %914 = vmatpush3.bf16.msra.mxu0 %v913_v26  ;;  %v922_v34 = vpack.c.bf16 %v541_v1, %v540_v33 }
  0x7e   :  { %915 = vmatprep.subr.bf16.mxu0 %v1059_v0 }
  0x81   :  { %917 = vmatpush3.bf16.msra.mxu0 %v916_v29 }
  0x82   :  { %918 = vmatprep.subr.bf16.mxu0 %v1059_v0 }
  0x85   :  { %920 = vmatpush3.bf16.msra.mxu0 %v919_v32 }
  0x86   :  { %921 = vmatprep.subr.bf16.mxu0 %v1059_v0 }
  0x89   :  { %923 = vmatpush3.bf16.msra.mxu0 %v922_v34 }
  0x8a   :  { %924 = vmatprep.subr.bf16.mxu0 %v1059_v0 }
  0x8d   :  { %926 = vmatpush3.bf16.msra.mxu0 %v925_v37 }
  0x8e   :  { %927 = vmatprep.subr.bf16.mxu0 %v1059_v0 }
  0x91   :  { %929 = vmatpush3.bf16.msra.mxu0 %v928_v40 }
  0x92   :  { %930 = vmatprep.subr.bf16.mxu0 %v1059_v0 }
  0x95   :  { %932 = vmatpush3.bf16.msra.mxu0 %v931_v43 }
  0x96   :  { %933 = vmatprep.subr.bf16.mxu0 %v1059_v0 }
  0x99   :  { %935 = vmatpush3.bf16.msra.mxu0 %v934_v46 }
 0x12e   :  { %v205_v59 = vpop.f32.mrb[0].mxu0 }
 0x12f   :  { %v206_v61 = vadd.f32 %v205_v59, %v127_v56  ;;  %v207_v0 = vpop.f32.mrb[1].mxu0  ;;  %v276_v62 = vpop.f32.mrb[0].mxu1 }
 0x130   :  { %v208_v63 = vadd.f32 %v207_v0, %v131_v57  ;;  %v277_v2 = vadd.f32 %v276_v62, %v135_v58  ;;  %v729_v3 = vpop.f32.mrb[1].mxu1 }
 0x132   :  { %v283_v4 = vcombine.low %v206_v61, %v208_v63  ;;  %v297_v5 = vrot.slane %v277_v2, %v289_v60 }
 0x134   :  { %v290_v6 = vrot.slane %v283_v4, %v289_v60 }
 0x136   :  { %v298_v7 = vcombine.low %v290_v6, %v297_v5 }
 0x138   :  { %v305_v8 = vrot.slane %v298_v7, %v289_v60 }
 0x13a   :  { %311 = vst.msk [vmem:[#allocation2] sm:$0x7] %vm309_vm1, %v305_v8 }
 0x141   :  { %v362_v9 = vld [vmem:[#allocation2] sm:$0x7] }
 0x142   :  { %v512_v14 = vrot.slane %v362_v9, 1  ;;  %v523_v27 = vrot.slane %v362_v9, 2 }
 0x14e   :  { %v429_v10 = vpop.f32.mrb[2].mxu0 }
 0x14f   :  { %v504_v11 = vadd.f32 %v429_v10, %v362_v9  ;;  %v431_v12 = vpop.f32.mrb[3].mxu0  ;;  %v500_v13 = vpop.f32.mrb[2].mxu1 }
 0x150   :  { %v764_v15 = vpop.f32.mrb[3].mxu1  ;;  %v514_v17 = vadd.f32 %v512_v14, %v431_v12  ;;  %v521_v25 = vadd.f32 %v500_v13, %v360_v22 }
 0x151   :  { %v642_v16 = vmul.f32 -1.442695, %v504_v11 }
 0x152   :  { %v643_v18 = vmul.f32 -1.442695, %v514_v17 }
 0x153   :  { %948 = vpow2.f32 %v642_v16 }
 0x154   :  { %950 = vpow2.f32 %v643_v18 }
 0x15d   :  { %v949_v19 = vpop.eup %948 }
 0x15e   :  { %v508_v20 = vadd.f32 1.0, %v949_v19  ;;  %v951_v21 = vpop.eup %950 }
 0x15f   :  { %v518_v24 = vadd.f32 1.0, %v951_v21 }
 0x160   :  { %952 = vrcp.f32 %v508_v20 }
 0x161   :  { %954 = vrcp.f32 %v518_v24 }
 0x16a   :  { %v953_v26 = vpop.eup %952 }
 0x16b   :  { %v522_v28 = vmul.f32 %v953_v26, %v521_v25  ;;  %v955_v30 = vpop.eup %954 }
 0x16c   :  { %v527_v31 = vsub.f32 1.0, %v955_v30  ;;  %v529_v33 = vmul.f32 %v955_v30, %v1185_v23 }
 0x16d   :  { %v525_v29 = vadd.f32 %v523_v27, %v522_v28 }
 0x16f   :  { %956 = vtanh.f32 %v525_v29 }
 0x179   :  { %v957_v32 = vpop.eup %956 }
 0x17a   :  { %v528_v1 = vmul.f32 %v957_v32, %v527_v31 }
 0x17c   :  { %v530_v34 = vadd.f32 %v529_v33, %v528_v1 }
 0x17e   :  { %531 = vst [vmem:[#allocation3] sm:$0x1] %v530_v34  ;;  %532 = vst [vmem:[%s1233_s9] sm:$0x1] %v530_v34 }
 0x185   :  { %v533_v35 = vld [vmem:[#allocation3] sm:$0x1] }
 0x186   :  { %798 = vmatmul.mubr.f32.vlgmr.msra.gmra.mrb[4].mxu0 %v533_v35 }
 0x259   :  { %v617_v37 = vpop.f32.mrb[4].mxu0 }
 0x25a   :  { %v618_v38 = vadd.f32 %v617_v37, %v550_v36  ;;  %v799_v39 = vpop.f32.mrb[5].mxu0 }
 0x25c   :  { %621 = vst [vmem:[#allocation10] sm:$0x1] %v618_v38 }
 0x25d   :  { %1035 = shalt.err (!%p1032_p0)
}
 0x25e   :  { %s1036_s17 = scalar_lea.hbm %s1232_s8, 16 }
 0x25f   :  { %p1037_p1 = scmp.ne.s32.totalorder %s1232_s8, %s1036_s17  ;;  %p1040_p2 = scmp.lt.u32.totalorder %s1036_s17, %s1232_s8 }
 0x261   :  { %p1042_p3 = pnand %p1040_p2, %p1037_p1 }
 0x263   :  { %1045 = shalt.err (!%p1042_p3)
}
 0x264   :  { %631 = dma.vmem_to_hbm [thread:$0]  %s629_s10, 16, %s1232_s8, [#allocation6]  }
 0x265   :  { %1050 = dma.done.wait [#allocation6], 16  }
 0x266   :  { %1051 = vsyncadd [#allocation6], 4294967280 }
 0x267   :  { %639 = vsyncpa [#allocation5], 1 }
 0x268   :  { %640 = vsyncpa [#allocation8], 1 }
 0x269   :  { %641 = vsyncpa [#allocation6], 1 }

</bundles_post_ra>
